<compile_context>
chip_gen: v7x
topology: tpu7x:2x2x1
jax: 0.10.0
libtpu: 0.0.40
codegen_flags: <defaults>
</compile_context>

<pallas_src>
import functools

import jax
import jax.numpy as jnp
from jax.experimental import pallas as pl
from jax.experimental.pallas import tpu as pltpu


def _depthpro_head_kernel(x_ref, w1_ref, b1_ref, w2_ref, b2_ref,
                          w3_ref, b3_ref, w4_ref, b4_ref, o_ref):
    """One (1, 3, P) pixel tile: synthetic backbone depth + 1x1-conv MLP head.

    Layout: P pixels on lanes, channels / hidden units on sublanes.
    """
    x = x_ref[0]                                                  # (3, P) f32

    # TODO(synk): the real DepthPro frozen ViT backbone (.infer()) has no
    # Pallas equivalent; substitute a deterministic positive depth map.
    # Explicit 3-row VALU sum (avoids a masked sublane/XLU reduce).
    depth = jnp.abs((x[0:1, :] + x[1:2, :] + x[2:3, :]) * (1.0 / 3.0)) + 0.1

    # layer 1: Conv2d(1, 64, 1) == (64,1) outer product -> VPU broadcast MAC.
    # f32 math, rounded to bf16 before feeding the MXU (halves the (64,P)
    # intermediate's vst/vld traffic and the vmatmul pushes).
    h1 = jnp.maximum(w1_ref[...] * depth + b1_ref[...], 0.0)      # (64, P) f32
    h1 = h1.astype(jnp.bfloat16)

    # layers 2 & 3: bf16 x bf16 MXU matmuls, f32 accumulation, pixels stay
    # on the lane axis.
    h2 = jnp.dot(w2_ref[...], h1, preferred_element_type=jnp.float32)
    h2 = jnp.maximum(h2 + b2_ref[...], 0.0).astype(jnp.bfloat16)  # (32, P)
    h3 = jnp.dot(w3_ref[...], h2, preferred_element_type=jnp.float32)
    h3 = jnp.maximum(h3 + b3_ref[...], 0.0)                       # (16, P) f32

    # layer 4: Conv2d(16, 1, 1) == K=16 dot with one output channel ->
    # VPU multiply + sublane reduce instead of a padded MXU pass.
    out = jnp.sum(h3 * w4_ref[...], axis=0, keepdims=True)        # (1, P)
    o_ref[0] = jnp.maximum(out + b4_ref[...], 0.0)


def init_depth_mlp_params(key):
    """Deterministic init of the MLP head weights (1x1 conv == dense).

    Stored in (C_out, C_in) orientation for the lane-dense kernel; the last
    layer's weight is stored as a (16, 1) column for the VPU reduce.
    """
    dims = [(1, 64), (64, 32), (32, 16), (16, 1)]
    params = []
    for i, (cin, cout) in enumerate(dims):
        kw, kb, key = jax.random.split(key, 3)
        scale = 1.0 / jnp.sqrt(jnp.maximum(cin, 1)).astype(jnp.float32)
        w = jax.random.normal(kw, (cout, cin), jnp.float32) * scale
        b = jax.random.normal(kb, (cout, 1), jnp.float32) * 0.01
        if i == 3:
            w = w.T            # (16, 1) column for VPU multiply + sublane sum
        params += [w, b]
    return params


def _pick_tile(hw128, batch, tile_cap):
    """Largest multiple-of-128 divisor of hw128 that is <= tile_cap.

    When batch == 1 the tile is also capped at hw128 // 2 (when possible) so
    the grid has at least 2 steps and both v7x TensorCores get work.
    """
    m = hw128 // 128
    cap = max(1, min(int(tile_cap), hw128) // 128)
    if batch == 1:
        cap = min(cap, max(1, m // 2))
    units = 1
    for d in range(1, m + 1):
        if m % d == 0 and d <= cap:
            units = d
    return units * 128


@functools.partial(jax.jit, static_argnames=("tile_hw",))
def depthpro_inference(x, params, tile_hw=16384):
    """Forward pass.  x: (B, 3, H, W) float32  ->  (B, 1, H, W) float32."""
    B, C, H, W = x.shape
    HW = H * W
    # NCHW viewed as (B, C, H*W): free reshape, channels on sublanes,
    # pixels on lanes.
    x3 = x.reshape(B, C, HW).astype(jnp.float32)

    # Pad only up to the next multiple of 128 lanes (usually a no-op) —
    # never a full tile's worth of host-side pad/slice copies.
    hw128 = ((HW + 127) // 128) * 128
    if hw128 != HW:
        x3 = jnp.pad(x3, ((0, 0), (0, 0), (0, hw128 - HW)))

    tile = _pick_tile(hw128, B, tile_hw)
    grid = (B, hw128 // tile)

    w1, b1, w2, b2, w3, b3, w4, b4 = params
    # bf16 operands for the two MXU matmuls (accumulation stays f32 in-kernel).
    ops = [w1, b1, w2.astype(jnp.bfloat16), b2,
           w3.astype(jnp.bfloat16), b3, w4, b4]

    def x_map(b, j):
        return (b, 0, j)

    def p_map(b, j):
        return (0, 0)

    in_specs = ([pl.BlockSpec((1, C, tile), x_map)]
                + [pl.BlockSpec(p.shape, p_map) for p in ops])

    out = pl.pallas_call(
        _depthpro_head_kernel,
        out_shape=jax.ShapeDtypeStruct((B, 1, hw128), jnp.float32),
        grid=grid,
        in_specs=in_specs,
        out_specs=pl.BlockSpec((1, 1, tile), x_map),
        compiler_params=pltpu.CompilerParams(
            dimension_semantics=("parallel", "parallel"),
            vmem_limit_bytes=48 * 1024 * 1024),
    )(x3, *ops)

    if hw128 != HW:
        out = out[:, :, :HW]
    return out.reshape(B, 1, H, W)


def _reference(x, params):
    """Plain-JAX reference mirroring the kernel numerics (bf16 MXU operands,
    f32 accumulation).  The pure-f32 module output differs from this by the
    bf16 rounding of the two middle matmul operands (~<1% relative)."""
    B, C, H, W = x.shape
    w1, b1, w2, b2, w3, b3, w4, b4 = params
    depth = jnp.abs(jnp.mean(x, axis=1, keepdims=True)) + 0.1        # (B,1,H,W)
    d = depth.reshape(B * H * W, 1)
    h = jnp.maximum(d * w1[:, 0][None, :] + b1[:, 0][None, :], 0.0)  # (N, 64)
    h = jnp.dot(h.astype(jnp.bfloat16), w2.astype(jnp.bfloat16).T,
                preferred_element_type=jnp.float32)
    h = jnp.maximum(h + b2[:, 0][None, :], 0.0)                      # (N, 32)
    h = jnp.dot(h.astype(jnp.bfloat16), w3.astype(jnp.bfloat16).T,
                preferred_element_type=jnp.float32)
    h = jnp.maximum(h + b3[:, 0][None, :], 0.0)                      # (N, 16)
    h = jnp.maximum(h @ w4 + b4[:, 0][None, :], 0.0)                 # (N, 1)
    return h.reshape(B, 1, H, W)


if __name__ == "__main__":
    key = jax.random.PRNGKey(0)
    kx, kp = jax.random.split(key)

    B, C, H, W = 2, 3, 16, 16          # module expects (B, 3, H, W)
    x = jax.random.uniform(kx, (B, C, H, W), jnp.float32)

    params = init_depth_mlp_params(kp)

    out = jax.block_until_ready(depthpro_inference(x, params))
    ref = _reference(x, params)

    assert out.shape == (B, 1, H, W), out.shape
    assert jnp.allclose(out, ref, atol=5e-3, rtol=5e-2), (
        "mismatch vs reference, max abs err = %f"
        % float(jnp.max(jnp.abs(out - ref))))

    print("KERNEL_OK")
</pallas_src>

<mosaic_0001>
module attributes {stable_mosaic.version = 11 : i64} {
  func.func @_depthpro_head_kernel(%arg0: i32, %arg1: i32, %arg2: memref<1x3x256xf32, #tpu.memory_space<vmem>>, %arg3: memref<64x1xf32, #tpu.memory_space<vmem>>, %arg4: memref<64x1xf32, #tpu.memory_space<vmem>>, %arg5: memref<32x64xbf16, #tpu.memory_space<vmem>>, %arg6: memref<32x1xf32, #tpu.memory_space<vmem>>, %arg7: memref<16x32xbf16, #tpu.memory_space<vmem>>, %arg8: memref<16x1xf32, #tpu.memory_space<vmem>>, %arg9: memref<16x1xf32, #tpu.memory_space<vmem>>, %arg10: memref<1x1xf32, #tpu.memory_space<vmem>>, %arg11: memref<1x1x256xf32, #tpu.memory_space<vmem>>) attributes {dimension_semantics = [#tpu.dimension_semantics<parallel>, #tpu.dimension_semantics<parallel>], iteration_bounds = array<i64: 2, 1>, scalar_prefetch = 0 : i64, scratch_operands = 0 : i64, tpu.core_type = #tpu.core_type<tc>, window_params = [{transform_indices = @transform_0, window_bounds = array<i64: 1, 3, 256>}, {pipeline_mode = #tpu.pipeline_mode<synchronous>, transform_indices = @transform_1, window_bounds = array<i64: 64, 1>}, {pipeline_mode = #tpu.pipeline_mode<synchronous>, transform_indices = @transform_2, window_bounds = array<i64: 64, 1>}, {pipeline_mode = #tpu.pipeline_mode<synchronous>, transform_indices = @transform_3, window_bounds = array<i64: 32, 64>}, {pipeline_mode = #tpu.pipeline_mode<synchronous>, transform_indices = @transform_4, window_bounds = array<i64: 32, 1>}, {pipeline_mode = #tpu.pipeline_mode<synchronous>, transform_indices = @transform_5, window_bounds = array<i64: 16, 32>}, {pipeline_mode = #tpu.pipeline_mode<synchronous>, transform_indices = @transform_6, window_bounds = array<i64: 16, 1>}, {pipeline_mode = #tpu.pipeline_mode<synchronous>, transform_indices = @transform_7, window_bounds = array<i64: 16, 1>}, {pipeline_mode = #tpu.pipeline_mode<synchronous>, transform_indices = @transform_8, window_bounds = array<i64: 1, 1>}, {transform_indices = @transform_9, window_bounds = array<i64: 1, 1, 256>}]} {
    %c0 = arith.constant 0 : index
    %c0_0 = arith.constant 0 : index
    %c0_1 = arith.constant 0 : index
    %0 = vector.load %arg2[%c0, %c0_0, %c0_1] : memref<1x3x256xf32, #tpu.memory_space<vmem>>, vector<1x3x256xf32>
    %1 = vector.shape_cast %0 : vector<1x3x256xf32> to vector<3x256xf32>
    %2 = vector.extract_strided_slice %1 {offsets = [0, 0], sizes = [1, 256], strides = [1, 1]} : vector<3x256xf32> to vector<1x256xf32>
    %3 = vector.extract_strided_slice %1 {offsets = [1, 0], sizes = [1, 256], strides = [1, 1]} : vector<3x256xf32> to vector<1x256xf32>
    %4 = arith.addf %2, %3 : vector<1x256xf32>
    %5 = vector.extract_strided_slice %1 {offsets = [2, 0], sizes = [1, 256], strides = [1, 1]} : vector<3x256xf32> to vector<1x256xf32>
    %6 = arith.addf %4, %5 : vector<1x256xf32>
    %cst = arith.constant 0.333333343 : f32
    %7 = vector.broadcast %cst : f32 to vector<1x256xf32>
    %8 = arith.mulf %6, %7 : vector<1x256xf32>
    %9 = math.absf %8 : vector<1x256xf32>
    %cst_2 = arith.constant 1.000000e-01 : f32
    %10 = vector.broadcast %cst_2 : f32 to vector<1x256xf32>
    %11 = arith.addf %9, %10 : vector<1x256xf32>
    %c0_3 = arith.constant 0 : index
    %c0_4 = arith.constant 0 : index
    %12 = vector.load %arg3[%c0_3, %c0_4] : memref<64x1xf32, #tpu.memory_space<vmem>>, vector<64x1xf32>
    %13 = vector.broadcast %12 : vector<64x1xf32> to vector<64x256xf32>
    %14 = vector.broadcast %11 : vector<1x256xf32> to vector<64x256xf32>
    %15 = arith.mulf %13, %14 : vector<64x256xf32>
    %c0_5 = arith.constant 0 : index
    %c0_6 = arith.constant 0 : index
    %16 = vector.load %arg4[%c0_5, %c0_6] : memref<64x1xf32, #tpu.memory_space<vmem>>, vector<64x1xf32>
    %17 = vector.broadcast %16 : vector<64x1xf32> to vector<64x256xf32>
    %18 = arith.addf %15, %17 : vector<64x256xf32>
    %cst_7 = arith.constant 0.000000e+00 : f32
    %19 = vector.broadcast %cst_7 : f32 to vector<64x256xf32>
    %20 = arith.maximumf %18, %19 : vector<64x256xf32>
    %21 = arith.truncf %20 : vector<64x256xf32> to vector<64x256xbf16>
    %c0_8 = arith.constant 0 : index
    %c0_9 = arith.constant 0 : index
    %22 = vector.load %arg5[%c0_8, %c0_9] : memref<32x64xbf16, #tpu.memory_space<vmem>>, vector<32x64xbf16>
    %cst_10 = arith.constant dense<0.000000e+00> : vector<32x256xf32>
    %23 = tpu.matmul %22, %21, %cst_10 {dimension_numbers = #tpu.dot_dimension_numbers<[1], [0], [0], [1], [0, 0, 1, 1], [], []>} : vector<32x64xbf16>, vector<64x256xbf16>, vector<32x256xf32> -> vector<32x256xf32>
    %c0_11 = arith.constant 0 : index
    %c0_12 = arith.constant 0 : index
    %24 = vector.load %arg6[%c0_11, %c0_12] : memref<32x1xf32, #tpu.memory_space<vmem>>, vector<32x1xf32>
    %25 = vector.broadcast %24 : vector<32x1xf32> to vector<32x256xf32>
    %26 = arith.addf %23, %25 : vector<32x256xf32>
    %cst_13 = arith.constant 0.000000e+00 : f32
    %27 = vector.broadcast %cst_13 : f32 to vector<32x256xf32>
    %28 = arith.maximumf %26, %27 : vector<32x256xf32>
    %29 = arith.truncf %28 : vector<32x256xf32> to vector<32x256xbf16>
    %c0_14 = arith.constant 0 : index
    %c0_15 = arith.constant 0 : index
    %30 = vector.load %arg7[%c0_14, %c0_15] : memref<16x32xbf16, #tpu.memory_space<vmem>>, vector<16x32xbf16>
    %cst_16 = arith.constant dense<0.000000e+00> : vector<16x256xf32>
    %31 = tpu.matmul %30, %29, %cst_16 {dimension_numbers = #tpu.dot_dimension_numbers<[1], [0], [0], [1], [0, 0, 1, 1], [], []>} : vector<16x32xbf16>, vector<32x256xbf16>, vector<16x256xf32> -> vector<16x256xf32>
    %c0_17 = arith.constant 0 : index
    %c0_18 = arith.constant 0 : index
    %32 = vector.load %arg8[%c0_17, %c0_18] : memref<16x1xf32, #tpu.memory_space<vmem>>, vector<16x1xf32>
    %33 = vector.broadcast %32 : vector<16x1xf32> to vector<16x256xf32>
    %34 = arith.addf %31, %33 : vector<16x256xf32>
    %cst_19 = arith.constant 0.000000e+00 : f32
    %35 = vector.broadcast %cst_19 : f32 to vector<16x256xf32>
    %36 = arith.maximumf %34, %35 : vector<16x256xf32>
    %c0_20 = arith.constant 0 : index
    %c0_21 = arith.constant 0 : index
    %37 = vector.load %arg9[%c0_20, %c0_21] : memref<16x1xf32, #tpu.memory_space<vmem>>, vector<16x1xf32>
    %38 = vector.broadcast %37 : vector<16x1xf32> to vector<16x256xf32>
    %39 = arith.mulf %36, %38 : vector<16x256xf32>
    %cst_22 = arith.constant dense<0.000000e+00> : vector<256xf32>
    %40 = vector.multi_reduction <add>, %39, %cst_22 [0] : vector<16x256xf32> to vector<256xf32>
    %41 = vector.shape_cast %40 : vector<256xf32> to vector<1x256xf32>
    %c0_23 = arith.constant 0 : index
    %c0_24 = arith.constant 0 : index
    %42 = vector.load %arg10[%c0_23, %c0_24] : memref<1x1xf32, #tpu.memory_space<vmem>>, vector<1x1xf32>
    %43 = vector.broadcast %42 : vector<1x1xf32> to vector<1x256xf32>
    %44 = arith.addf %41, %43 : vector<1x256xf32>
    %cst_25 = arith.constant 0.000000e+00 : f32
    %45 = vector.broadcast %cst_25 : f32 to vector<1x256xf32>
    %46 = arith.maximumf %44, %45 : vector<1x256xf32>
    %c0_26 = arith.constant 0 : index
    %c0_27 = arith.constant 0 : index
    %c0_28 = arith.constant 0 : index
    %47 = vector.load %arg11[%c0_26, %c0_27, %c0_28] : memref<1x1x256xf32, #tpu.memory_space<vmem>>, vector<1x1x256xf32>
    %48 = vector.shape_cast %47 : vector<1x1x256xf32> to vector<1x256xf32>
    %49 = vector.shape_cast %46 : vector<1x256xf32> to vector<1x1x256xf32>
    tpu.vector_store %arg11[%c0_26, %c0_27, %c0_28], %49 {strides = array<i32>} : memref<1x1x256xf32, #tpu.memory_space<vmem>>, vector<1x1x256xf32>,
    return
  }
  func.func @transform_0(%arg0: i32, %arg1: i32) -> (i32, i32, i32) {
    %c0_i32 = arith.constant 0 : i32
    %c0_i32_0 = arith.constant 0 : i32
    return %arg0, %c0_i32, %arg1 : i32, i32, i32
  }
  func.func @transform_1(%arg0: i32, %arg1: i32) -> (i32, i32) {
    %c0_i32 = arith.constant 0 : i32
    %c0_i32_0 = arith.constant 0 : i32
    %c0_i32_1 = arith.constant 0 : i32
    return %c0_i32, %c0_i32_0 : i32, i32
  }
  func.func @transform_2(%arg0: i32, %arg1: i32) -> (i32, i32) {
    %c0_i32 = arith.constant 0 : i32
    %c0_i32_0 = arith.constant 0 : i32
    %c0_i32_1 = arith.constant 0 : i32
    return %c0_i32, %c0_i32_0 : i32, i32
  }
  func.func @transform_3(%arg0: i32, %arg1: i32) -> (i32, i32) {
    %c0_i32 = arith.constant 0 : i32
    %c0_i32_0 = arith.constant 0 : i32
    %c0_i32_1 = arith.constant 0 : i32
    return %c0_i32, %c0_i32_0 : i32, i32
  }
  func.func @transform_4(%arg0: i32, %arg1: i32) -> (i32, i32) {
    %c0_i32 = arith.constant 0 : i32
    %c0_i32_0 = arith.constant 0 : i32
    %c0_i32_1 = arith.constant 0 : i32
    return %c0_i32, %c0_i32_0 : i32, i32
  }
  func.func @transform_5(%arg0: i32, %arg1: i32) -> (i32, i32) {
    %c0_i32 = arith.constant 0 : i32
    %c0_i32_0 = arith.constant 0 : i32
    %c0_i32_1 = arith.constant 0 : i32
    return %c0_i32, %c0_i32_0 : i32, i32
  }
  func.func @transform_6(%arg0: i32, %arg1: i32) -> (i32, i32) {
    %c0_i32 = arith.constant 0 : i32
    %c0_i32_0 = arith.constant 0 : i32
    %c0_i32_1 = arith.constant 0 : i32
    return %c0_i32, %c0_i32_0 : i32, i32
  }
  func.func @transform_7(%arg0: i32, %arg1: i32) -> (i32, i32) {
    %c0_i32 = arith.constant 0 : i32
    %c0_i32_0 = arith.constant 0 : i32
    %c0_i32_1 = arith.constant 0 : i32
    return %c0_i32, %c0_i32_0 : i32, i32
  }
  func.func @transform_8(%arg0: i32, %arg1: i32) -> (i32, i32) {
    %c0_i32 = arith.constant 0 : i32
    %c0_i32_0 = arith.constant 0 : i32
    %c0_i32_1 = arith.constant 0 : i32
    return %c0_i32, %c0_i32_0 : i32, i32
  }
  func.func @transform_9(%arg0: i32, %arg1: i32) -> (i32, i32, i32) {
    %c0_i32 = arith.constant 0 : i32
    %c0_i32_0 = arith.constant 0 : i32
    return %arg0, %c0_i32, %arg1 : i32, i32, i32
  }
}

</mosaic_0001>

<bundles_post_ra>
// kernel: depthpro_inference.1
= control target key start
LH: loop header
LB: loop body
LE: loop exit
PB: predicated region body
PF: predicated region fallthrough
CT: control target
= control target key end

     0   :  { %s1014_s11 = smov 0   ;;  %s1016_s12 = smov 0   ;;  %s1174_s0 = inlined_call_operand.vmem [shape: f32[2,3,256], index: 0, kind: input, shape index: {}]   ;;  %s1175_s1 = inlined_call_operand.vmem [shape: f32[64,1], index: 1, kind: input, shape index: {}]   ;;  %s1176_s2 = inlined_call_operand.vmem [shape: f32[64,1], index: 2, kind: input, shape index: {}]   ;;  %s1177_s3 = inlined_call_operand.vmem [shape: bf16[32,64], index: 3, kind: input, shape index: {}]   ;;  %s1178_s4 = inlined_call_operand.vmem [shape: f32[32,1], index: 4, kind: input, shape index: {}]   ;;  %s1179_s5 = inlined_call_operand.vmem [shape: bf16[16,32], index: 5, kind: input, shape index: {}]   ;;  %s1180_s6 = inlined_call_operand.vmem [shape: f32[16,1], index: 6, kind: input, shape index: {}]   ;;  %s1181_s7 = inlined_call_operand.vmem [shape: f32[16,1], index: 7, kind: input, shape index: {}]   ;;  %s1182_s8 = inlined_call_operand.<no memory space> [shape: f32[1,1], index: 8, kind: input, shape index: {}]   ;;  %s1183_s9 = inlined_call_operand.vmem [shape: f32[2,1,256], index: 9, kind: output, shape index: {}]  }
   0x1   :  { %v14_v0 = vstv %s1182_s8  ;;  %s1018_s13 = smov 0  }
   0x2   :  { %15 = vst [vmem:[#allocation2] sm:$0x1] %v14_v0 }
   0x3 LB: > { %s33_s8 = sadd.s32 1, %s953_s12  ;;  %p889_p0 = scmp.ge.s32.totalorder %s957_s13, 1  ;;  %s957_s13 = sphi %s1018_s13, %s21_s13   ;;  %s953_s12 = sphi %s1016_s12, %s1185_s12   ;;  %s949_s11 = sphi %s1014_s11, %s1184_s11  }
   0x4   : > { %p35_p1 = scmp.ge.s32.totalorder %s33_s8, 2  ;;  %p310_p2 = scmp.lt.s32.totalorder %s957_s13, 3 }
   0x6   : > { %s1187_s8 = smov (%p35_p1, %s33_s8), 0  ;;  %p311_p3 = pnand %p889_p0, %p310_p2 }
   0x7   : > { %v469_v1 = vld [vmem:[%s1176_s2] sm:$0xff] (!%p311_p3)  ;;  %v959_v3 = vmov (!%p311_p3), 0   ;;  %v470_v4 = vld [vmem:[%s1176_s2 + $0x8] sm:$0xff] (!%p311_p3)  ;;  %v389_v6 = vld [vmem:[%s1175_s1 + $0x18] sm:$0xff] (!%p311_p3)  ;;  %p354_p4 = scmp.lt.s32.totalorder (!%p311_p3), %s949_s11, 1  ;;  %v435_v32 = vlaneseq (!%p311_p3)  ;;  %vm595_vm0 = vcmask (!%p311_p3), 523264  }
   0x8   : > { %314 = sbr.rel (%p311_p3) target bundleno = 654 (0x28e), region = 56  ;;  %v386_v2 = vld [vmem:[%s1175_s1] sm:$0xff] (!%p311_p3)  ;;  %931 = vset.pattern.permute.xlu1 (!%p311_p3), %v959_v3  ;;  %930 = vset.pattern.permute.xlu0 (!%p311_p3), %v959_v3  ;;  %v387_v5 = vld [vmem:[%s1175_s1 + $0x8] sm:$0xff] (!%p311_p3)  ;;  %v388_v7 = vld [vmem:[%s1175_s1 + $0x10] sm:$0xff] (!%p311_p3)  ;;  %vm686_vm1 = vcmask (!%p311_p3), 261120  }
   0x9   : > { %479 = vperm.xlu1 (!%p311_p3), %931, %v469_v1   ;;  %396 = vperm.xlu0 (!%p311_p3), %930, %v386_v2   ;;  %v472_v8 = vld [vmem:[%s1176_s2 + $0x18] sm:$0xff] (!%p311_p3)  ;;  %v471_v9 = vld [vmem:[%s1176_s2 + $0x10] sm:$0xff] (!%p311_p3)  ;;  %v391_v10 = vld [vmem:[%s1175_s1 + $0x28] sm:$0xff] (!%p311_p3)  ;;  %v1119_v34 = vshrl.u32 (!%p311_p3), %v435_v32, 7  ;;  %vm801_vm2 = vcmp.lt.s32.totalorder (!%p311_p3), %v435_v32, 256 }
   0xa   : > { %634 = vmatprep.mubr.bf16.mxu0 (!%p311_p3), %v959_v3  ;;  %722 = vmatprep.mubr.bf16.mxu1 (!%p311_p3), %v959_v3  ;;  %v390_v11 = vld [vmem:[%s1175_s1 + $0x20] sm:$0xff] (!%p311_p3)  ;;  %v474_v12 = vld [vmem:[%s1176_s2 + $0x28] sm:$0xff] (!%p311_p3)  ;;  %v393_v14 = vld [vmem:[%s1175_s1 + $0x38] sm:$0xff] (!%p311_p3) }
   0xb   : > { %v473_v13 = vld [vmem:[%s1176_s2 + $0x20] sm:$0xff] (!%p311_p3)  ;;  %v392_v15 = vld [vmem:[%s1175_s1 + $0x30] sm:$0xff] (!%p311_p3)  ;;  %v476_v16 = vld [vmem:[%s1176_s2 + $0x38] sm:$0xff] (!%p311_p3)  ;;  %v1122_v36 = vsub.s32 (!%p311_p3), 0, %v1119_v34  ;;  %v441_v37 = vsub.s32 (!%p311_p3), 4, %v1119_v34 }
   0xc   : > { %v475_v17 = vld [vmem:[%s1176_s2 + $0x30] sm:$0xff] (!%p311_p3)  ;;  %v562_v18 = vld [vmem:[%s1178_s4 + $0x8] sm:$0xff] (!%p311_p3)  ;;  %v561_v19 = vld [vmem:[%s1178_s4] sm:$0xff] (!%p311_p3) }
   0xd   : > { %484 = vperm.xlu1 (!%p311_p3), %931, %v470_v4   ;;  %401 = vperm.xlu0 (!%p311_p3), %930, %v387_v5   ;;  %v564_v20 = vld [vmem:[%s1178_s4 + $0x18] sm:$0xff] (!%p311_p3)  ;;  %v563_v21 = vld [vmem:[%s1178_s4 + $0x10] sm:$0xff] (!%p311_p3)  ;;  %v670_v22 = vld [vmem:[%s1180_s6 + $0x8] sm:$0xff] (!%p311_p3) }
   0xe   : > { %v669_v23 = vld [vmem:[%s1180_s6] sm:$0xff] (!%p311_p3)  ;;  %v738_v24 = vld [vmem:[%s1181_s7 + $0x8] sm:$0xff] (!%p311_p3) }
   0xf   : > { %v737_v25 = vld [vmem:[%s1181_s7] sm:$0xff]  ;;  %s1189_s11 = smov (!%p354_p4, %s949_s11), 1 }
  0x10   : > { %v767_v26 = vld [vmem:[#allocation2] sm:$0x1]  ;;  %s903_s26 = sshll.u32 %s1189_s11, 3  ;;  %s892_s18 = sshll.u32 %s1189_s11, 1 }
  0x11   : > { %411 = vperm.xlu1 %931, %v389_v6   ;;  %406 = vperm.xlu0 %930, %v388_v7   ;;  %s361_s29 = scalar_lea.vmem %s1174_s0, %s903_s26  ;;  %s370_s21 = scalar_lea.vmem %s1183_s9, %s892_s18 }
  0x12   : > { %v373_v27 = vld [vmem:[%s361_s29] sm:$0x77] }
  0x13   : > { %v893_v28 = vrot.slane %v373_v27, 9  ;;  %v894_v30 = vrot.slane %v373_v27, 10 }
  0x15   : > { %494 = vperm.xlu1 %931, %v472_v8   ;;  %489 = vperm.xlu0 %930, %v471_v9   ;;  %v378_v29 = vadd.f32 %v893_v28, %v373_v27 }
  0x17   : > { %v382_v31 = vadd.f32 %v894_v30, %v378_v29 }
  0x19   : > { %421 = vperm.xlu1 %931, %v391_v10   ;;  %416 = vperm.xlu0 %930, %v390_v11   ;;  %v383_v33 = vmul.f32 0.33333334, %v382_v31 }
  0x1b   : > { %v384_v35 = vand.u32 2147483647, %v383_v33 }
  0x1d   : > { %504 = vperm.xlu1 %931, %v474_v12   ;;  %499 = vperm.xlu0 %930, %v473_v13   ;;  %v385_v38 = vadd.f32 0.1, %v384_v35 }
  0x1f   : > { %v438_v39 = vrot.slane %v385_v38, %v1122_v36  ;;  %v442_v40 = vrot.slane %v385_v38, %v441_v37 }
  0x21   : > { %431 = vperm.xlu1 %931, %v393_v14   ;;  %426 = vperm.xlu0 %930, %v392_v15   ;;  %v1127_v41 = vrot.slane %v438_v39, %v1122_v36  ;;  %v1130_v42 = vrot.slane %v442_v40, %v1122_v36 }
  0x25   : > { %514 = vperm.xlu1 %931, %v476_v16   ;;  %509 = vperm.xlu0 %930, %v475_v17  }
  0x29   : > { %572 = vperm.xlu1 %931, %v562_v18   ;;  %567 = vperm.xlu0 %930, %v561_v19  }
  0x2d   : > { %582 = vperm.xlu1 %931, %v564_v20   ;;  %577 = vperm.xlu0 %930, %v563_v21  }
  0x31   : > { %678 = vperm.xlu1 %931, %v670_v22   ;;  %673 = vperm.xlu0 %930, %v669_v23  }
  0x35   : > { %746 = vperm.xlu1 %931, %v738_v24   ;;  %741 = vperm.xlu0 %930, %v737_v25  }
  0x39   : > { %770 = vperm.xlu0 %930, %v767_v26  }
  0x88   : > { %v480_v43 = vpop.permute.xlu1 %479  ;;  %v397_v44 = vpop.permute.xlu0 %396 }
  0x89   : > { %v453_v45 = vmul.f32 %v1127_v41, %v397_v44  ;;  %v454_v46 = vmul.f32 %v1130_v42, %v397_v44 }
  0x8b   : > { %v517_v51 = vadd.f32 %v480_v43, %v453_v45  ;;  %v518_v52 = vadd.f32 %v480_v43, %v454_v46 }
  0x8c   : > { %v485_v47 = vpop.permute.xlu1 %484  ;;  %v402_v48 = vpop.permute.xlu0 %401 }
  0x8d   : > { %v455_v49 = vmul.f32 %v1127_v41, %v402_v48  ;;  %v456_v50 = vmul.f32 %v1130_v42, %v402_v48  ;;  %v534_v57 = vmax.f32 %v518_v52, 0.0  ;;  %v533_v59 = vmax.f32 %v517_v51, 0.0 }
  0x8f   : > { %v519_v53 = vadd.f32 %v485_v47, %v455_v49  ;;  %v520_v54 = vadd.f32 %v485_v47, %v456_v50 }
  0x90   : > { %v412_v55 = vpop.permute.xlu1 %411  ;;  %v407_v56 = vpop.permute.xlu0 %406 }
  0x91   : > { %v536_v58 = vmax.f32 %v520_v54, 0.0  ;;  %v535_v60 = vmax.f32 %v519_v53, 0.0  ;;  %v459_v61 = vmul.f32 %v1127_v41, %v412_v55  ;;  %v460_v62 = vmul.f32 %v1130_v42, %v412_v55 }
  0x92   : > { %v457_v63 = vmul.f32 %v1127_v41, %v407_v56  ;;  %v458_v0 = vmul.f32 %v1130_v42, %v407_v56 }
  0x93   : > { %v550_v4 = vpack.c.bf16 %v536_v58, %v534_v57  ;;  %v549_v5 = vpack.c.bf16 %v535_v60, %v533_v59 }
  0x94   : > { %v495_v1 = vpop.permute.xlu1 %494  ;;  %v490_v2 = vpop.permute.xlu0 %489 }
  0x95   : > { %v523_v6 = vadd.f32 %v495_v1, %v459_v61  ;;  %v524_v7 = vadd.f32 %v495_v1, %v460_v62  ;;  %v521_v8 = vadd.f32 %v490_v2, %v457_v63  ;;  %v522_v9 = vadd.f32 %v490_v2, %v458_v0  ;;  %602 = vmatprep.subr.bf16.mxu0 %v550_v4 }
  0x96   : > { %603 = vmatpush1.bf16.msra.mxu0 %v549_v5 }
  0x97   : > { %v539_v10 = vmax.f32 %v523_v6, 0.0  ;;  %v540_v11 = vmax.f32 %v524_v7, 0.0  ;;  %v537_v12 = vmax.f32 %v521_v8, 0.0  ;;  %v538_v13 = vmax.f32 %v522_v9, 0.0 }
  0x98   : > { %v422_v14 = vpop.permute.xlu1 %421  ;;  %v417_v15 = vpop.permute.xlu0 %416 }
  0x99   : > { %v552_v16 = vpack.c.bf16 %v540_v11, %v538_v13  ;;  %v551_v17 = vpack.c.bf16 %v539_v10, %v537_v12  ;;  %v463_v18 = vmul.f32 %v1127_v41, %v422_v14  ;;  %v464_v19 = vmul.f32 %v1130_v42, %v422_v14 }
  0x9a   : > { %v461_v20 = vmul.f32 %v1127_v41, %v417_v15  ;;  %v462_v21 = vmul.f32 %v1130_v42, %v417_v15 }
  0x9b   : > { %604 = vmatprep.subr.bf16.mxu0 %v552_v16 }
  0x9c   : > { %v505_v22 = vpop.permute.xlu1 %504  ;;  %v500_v23 = vpop.permute.xlu0 %499  ;;  %605 = vmatpush1.bf16.msra.mxu0 %v551_v17 }
  0x9d   : > { %v527_v24 = vadd.f32 %v505_v22, %v463_v18  ;;  %v528_v25 = vadd.f32 %v505_v22, %v464_v19  ;;  %v525_v26 = vadd.f32 %v500_v23, %v461_v20  ;;  %v526_v27 = vadd.f32 %v500_v23, %v462_v21 }
  0x9f   : > { %v543_v28 = vmax.f32 %v527_v24, 0.0  ;;  %v544_v29 = vmax.f32 %v528_v25, 0.0  ;;  %v541_v30 = vmax.f32 %v525_v26, 0.0  ;;  %v542_v31 = vmax.f32 %v526_v27, 0.0  ;;  %v934_v25 = vld [vmem:[%s1179_s5] sm:$0xff]  }
  0xa0   : > { %v432_v33 = vpop.permute.xlu1 %431  ;;  %v427_v35 = vpop.permute.xlu0 %426 }
  0xa1   : > { %v554_v37 = vpack.c.bf16 %v544_v29, %v542_v31  ;;  %v553_v38 = vpack.c.bf16 %v543_v28, %v541_v30  ;;  %v467_v39 = vmul.f32 %v1127_v41, %v432_v33  ;;  %v468_v40 = vmul.f32 %v1130_v42, %v432_v33 }
  0xa2   : > { %v465_v43 = vmul.f32 %v1127_v41, %v427_v35  ;;  %v466_v44 = vmul.f32 %v1130_v42, %v427_v35  ;;  %v932_v41 = vld [vmem:[%s1177_s3] sm:$0xff]   ;;  %v933_v42 = vld [vmem:[%s1177_s3 + $0x8] sm:$0xff]  }
  0xa3   : > { %606 = vmatprep.subr.bf16.mxu0 %v554_v37 }
  0xa4   : > { %v515_v45 = vpop.permute.xlu1 %514  ;;  %v510_v46 = vpop.permute.xlu0 %509  ;;  %607 = vmatpush1.bf16.msra.mxu0 %v553_v38 }
  0xa5   : > { %v531_v47 = vadd.f32 %v515_v45, %v467_v39  ;;  %v532_v48 = vadd.f32 %v515_v45, %v468_v40  ;;  %v529_v49 = vadd.f32 %v510_v46, %v465_v43  ;;  %v530_v50 = vadd.f32 %v510_v46, %v466_v44 }
  0xa7   : > { %v547_v51 = vmax.f32 %v531_v47, 0.0  ;;  %v548_v52 = vmax.f32 %v532_v48, 0.0  ;;  %v545_v53 = vmax.f32 %v529_v49, 0.0  ;;  %v546_v54 = vmax.f32 %v530_v50, 0.0 }
  0xa8   : > { %v568_v57 = vpop.permute.xlu0 %567  ;;  %v573_v61 = vpop.permute.xlu1 %572 }
  0xa9   : > { %v556_v55 = vpack.c.bf16 %v548_v52, %v546_v54  ;;  %v555_v56 = vpack.c.bf16 %v547_v51, %v545_v53 }
  0xab   : > { %608 = vmatprep.subr.bf16.mxu0 %v556_v55 }
  0xac   : > { %609 = vmatpush1.bf16.msra.mxu0 %v555_v56  ;;  %v578_v8 = vpop.permute.xlu0 %577  ;;  %v583_v13 = vpop.permute.xlu1 %582 }
  0xaf   : > { %897 = vmatmul.mubr.msk.bf16.vlgmr.msra.gmra.mrb[0].mxu0 %vm595_vm0, %v932_v41 }
  0xb0   : > { %644 = vmatprep.mubr.bf16.mxu0 %v959_v3  ;;  %v679_v26 = vpop.permute.xlu1 %678  ;;  %v674_v27 = vpop.permute.xlu0 %673 }
  0xb4   : > { %v747_v44 = vpop.permute.xlu1 %746  ;;  %v742_v45 = vpop.permute.xlu0 %741 }
  0xb7   : > { %898 = vmatmul.mubr.msk.bf16.gmra.mrb[4].mxu0 %vm595_vm0, %v933_v42 }
 0x182   : > { %v636_v58 = vpop.f32.mrb[0].mxu0 }
 0x183   : > { %v637_v59 = vadd.f32 %v636_v58, %v568_v57  ;;  %v638_v60 = vpop.f32.mrb[1].mxu0  ;;  %v771_v58 = vpop.permute.xlu0 %770 }
 0x184   : > { %v639_v62 = vadd.f32 %v638_v60, %v568_v57  ;;  %v640_v63 = vpop.f32.mrb[2].mxu0  ;;  %v960_v60 = vmov 1966171168  }
 0x185   : > { %v641_v0 = vadd.f32 %v640_v63, %v573_v61  ;;  %v642_v1 = vpop.f32.mrb[3].mxu0  ;;  %v655_v4 = vmax.f32 %v637_v59, 0.0 }
 0x186   : > { %v643_v2 = vadd.f32 %v642_v1, %v573_v61  ;;  %v656_v6 = vmax.f32 %v639_v62, 0.0  ;;  %v785_v61 = vunpack.c.l.s4 %v960_v60 }
 0x187   : > { %v657_v5 = vmax.f32 %v641_v0, 0.0  ;;  %v776_v0 = vrot.slane %v771_v58, %v1122_v36 }
 0x188   : > { %v658_v7 = vmax.f32 %v643_v2, 0.0 }
 0x189   : > { %v663_v3 = vpack.c.bf16 %v657_v5, %v655_v4  ;;  %v786_v4 = vunpack.c.0.s8 %v785_v61 }
 0x18a   : > { %v646_v9 = vpop.f32.mrb[4].mxu0  ;;  %v664_v10 = vpack.c.bf16 %v658_v7, %v656_v6 }
 0x18b   : > { %v647_v11 = vadd.f32 %v646_v9, %v578_v8  ;;  %v648_v12 = vpop.f32.mrb[5].mxu0 }
 0x18c   : > { %v649_v14 = vadd.f32 %v648_v12, %v578_v8  ;;  %v650_v15 = vpop.f32.mrb[6].mxu0  ;;  %690 = vmatprep.subr.bf16.mxu1 %v664_v10  ;;  %v789_v8 = vsub.s32 %v786_v4, %v1119_v34 }
 0x18d   : > { %v651_v16 = vadd.f32 %v650_v15, %v583_v13  ;;  %v652_v17 = vpop.f32.mrb[7].mxu0  ;;  %691 = vmatpush1.bf16.msra.mxu1 %v663_v3  ;;  %v659_v19 = vmax.f32 %v647_v11, 0.0 }
 0x18e   : > { %v653_v18 = vadd.f32 %v652_v17, %v583_v13  ;;  %v660_v21 = vmax.f32 %v649_v14, 0.0 }
 0x18f   : > { %v661_v20 = vmax.f32 %v651_v16, 0.0 }
 0x190   : > { %v662_v22 = vmax.f32 %v653_v18, 0.0 }
 0x191   : > { %v665_v23 = vpack.c.bf16 %v661_v20, %v659_v19 }
 0x192   : > { %v666_v24 = vpack.c.bf16 %v662_v22, %v660_v21 }
 0x194   : > { %692 = vmatprep.subr.bf16.mxu1 %v666_v24 }
 0x195   : > { %693 = vmatpush1.bf16.msra.mxu1 %v665_v23 }
 0x198   : > { %900 = vmatmul.mubr.msk.bf16.vlgmr.msra.gmra.mrb[0].mxu1 %vm686_vm1, %v934_v25 }
 0x26b   : > { %v724_v28 = vpop.f32.mrb[0].mxu1 }
 0x26c   : > { %v725_v29 = vadd.f32 %v724_v28, %v674_v27  ;;  %v726_v30 = vpop.f32.mrb[1].mxu1 }
 0x26d   : > { %v727_v31 = vadd.f32 %v726_v30, %v674_v27  ;;  %v728_v33 = vpop.f32.mrb[2].mxu1 }
 0x26e   : > { %v733_v35 = vmax.f32 %v725_v29, 0.0  ;;  %v729_v37 = vadd.f32 %v728_v33, %v679_v26  ;;  %v730_v38 = vpop.f32.mrb[3].mxu1 }
 0x26f   : > { %v734_v39 = vmax.f32 %v727_v31, 0.0  ;;  %v731_v40 = vadd.f32 %v730_v38, %v679_v26 }
 0x270   : > { %v735_v43 = vmax.f32 %v729_v37, 0.0  ;;  %v749_v47 = vmul.f32 %v742_v45, %v733_v35 }
 0x271   : > { %v736_v46 = vmax.f32 %v731_v40, 0.0  ;;  %v750_v49 = vmul.f32 %v742_v45, %v734_v39 }
 0x272   : > { %v751_v48 = vmul.f32 %v747_v44, %v735_v43 }
 0x273   : > { %v752_v50 = vmul.f32 %v747_v44, %v736_v46 }
 0x274   : > { %v753_v51 = vadd.f32 %v751_v48, %v749_v47 }
 0x275   : > { %v760_v52 = vadd.f32 %v752_v50, %v750_v49 }
 0x276   : > { %v754_v53 = vrot.slane %v753_v51, 4 }
 0x277   : > { %v761_v54 = vrot.slane %v760_v52, 4 }
 0x278   : > { %v755_v55 = vadd.f32 %v754_v53, %v753_v51 }
 0x279   : > { %v762_v56 = vadd.f32 %v761_v54, %v760_v52 }
 0x27a   : > { %v756_v41 = vrot.slane %v755_v55, 2 }
 0x27b   : > { %v763_v42 = vrot.slane %v762_v56, 2 }
 0x27c   : > { %v757_v57 = vadd.f32 %v756_v41, %v755_v55 }
 0x27d   : > { %v764_v59 = vadd.f32 %v763_v42, %v762_v56 }
 0x27e   : > { %v758_v62 = vrot.slane %v757_v57, 1 }
 0x27f   : > { %v765_v63 = vrot.slane %v764_v59, 1 }
 0x280   : > { %v759_v1 = vadd.f32 %v758_v62, %v757_v57 }
 0x281   : > { %v766_v2 = vadd.f32 %v765_v63, %v764_v59 }
 0x282   : > { %v777_v5 = vadd.f32 %v776_v0, %v759_v1 }
 0x283   : > { %v778_v6 = vadd.f32 %v776_v0, %v766_v2 }
 0x284   : > { %v779_v7 = vmax.f32 %v777_v5, 0.0 }
 0x285   : > { %v780_v3 = vmax.f32 %v778_v6, 0.0 }
 0x287   : > { %v783_v9 = vcombine.low %v779_v7, %v780_v3 }
 0x289   : > { %v790_v10 = vrot.slane %v783_v9, %v789_v8 }
 0x28b   : > { %v797_v11 = vrot.slane %v790_v10, %v789_v8 }
 0x28d   : > { %803 = vst.msk [vmem:[%s370_s21] sm:$0x3] %vm801_vm2, %v797_v11 }
 0x28e PF: > { %s21_s13 = sadd.s32 1, %s957_s13   ;;  %s1184_s11 = smov %s953_s12 }
 0x28f   : > { %p18_p5 = scmp.ge.s32.totalorder %s21_s13, 4   ;;  %s1185_s12 = smov %s1187_s8 }
 0x291   :  { %20 = sbr.rel (!%p18_p5) target bundleno = 3 (0x3), region = 86 }

</bundles_post_ra>
